<compile_context>
chip_gen: v5e
topology: v5e:2x2
jax: 0.10.0
libtpu: 0.0.40
codegen_flags: <defaults>
</compile_context>

<pallas_src>
import math

import jax
import jax.numpy as jnp
from jax.experimental import pallas as pl
from jax.experimental.pallas import tpu as pltpu


def _round_up(x, m):
    return ((x + m - 1) // m) * m


def _vmem_budget_bytes():
    """Per-generation budget for this kernel's resident (double-buffered) blocks.

    v5e / v6e: 128 MiB physical -> 64 MiB budget
    v7x:        64 MiB physical -> 48 MiB budget
    unknown:   conservative 32 MiB
    """
    try:
        cap = int(pltpu.get_tpu_info().vmem_capacity_bytes)
    except Exception:
        return 32 << 20
    return min(64 << 20, (cap * 3) // 4)


# ----------------------------------------------------------------------------
# Pallas kernel: broadcast add of the positional-embedding table over batch.
# Works for both (B, tr, C)+(tr, C) and (B, T)+(1, T) block shapes.
# ----------------------------------------------------------------------------
def _pos_add_kernel(x_ref, pos_ref, o_ref):
    # Add in the promoted precision (e.g. bf16 x + f32 pos -> f32), cast once.
    o_ref[...] = (x_ref[...] + pos_ref[...]).astype(o_ref.dtype)


def flatten_pos_embed_forward(x, pos_embed, *, donate_x=False, max_block_rows=None):
    """FlattenPosEmbedBlock.forward.

    x:         (B, L, D) flattened patch embeddings, L == prod(seqlens).
    pos_embed: (1, *seqlens, D) positional-embedding table (learnable default).
    donate_x:  alias x -> output (caller must be able to donate x).
    returns    (B, L, D) == x + pos_embed (broadcast over batch), dtype of x.
    """
    b, l, d = x.shape
    assert math.prod(pos_embed.shape[1:-1]) == l and pos_embed.shape[-1] == d, (
        "pos_embed seqlens/dim must match the flattened input")

    flat = l * d
    itemsize = max(jnp.dtype(x.dtype).itemsize, jnp.dtype(pos_embed.dtype).itemsize)
    budget = _vmem_budget_bytes()
    io_alias = {0: 0} if donate_x else {}

    # Pick a lane-dense width C: multiple of 128, <= 1024, exact divisor of L*D.
    lane = 0
    for cand in range(1024, 127, -128):
        if flat % cand == 0:
            lane = cand
            break

    if lane:
        # ------------------ main path: (B, R, C) lane-dense layout ------------------
        rows = flat // lane
        xf = x.reshape(b, rows, lane)
        pos = pos_embed.reshape(rows, lane)

        # Real double-buffered cost per sublane row: 2 * (x + out + pos) blocks.
        per_row_bytes = 2 * (2 * b + 1) * lane * itemsize
        max_rows = max(8, int(budget * 0.85) // per_row_bytes)
        # Per-buffer cap (~16 MiB): diminishing returns beyond this on any gen.
        max_rows = min(max_rows, max(8, (16 << 20) // (b * lane * itemsize)))
        if max_block_rows is not None:
            max_rows = min(max_rows, max_block_rows)

        tile_r = min(_round_up(rows, 8), (max_rows // 8) * 8)
        tile_r = max(8, tile_r)

        steps = pl.cdiv(rows, tile_r)
        # Prefer an even step count so v7x's two TensorCores split work evenly.
        if steps > 2 and steps % 2 == 1:
            t2 = _round_up(pl.cdiv(rows, steps + 1), 8)
            if t2 >= 8 and pl.cdiv(rows, t2) % 2 == 0:
                tile_r = t2
                steps = pl.cdiv(rows, tile_r)

        out = pl.pallas_call(
            _pos_add_kernel,
            out_shape=jax.ShapeDtypeStruct((b, rows, lane), x.dtype),
            grid=(steps,),
            in_specs=[
                pl.BlockSpec((b, tile_r, lane), lambda i: (0, i, 0)),
                pl.BlockSpec((tile_r, lane), lambda i: (i, 0)),
            ],
            out_specs=pl.BlockSpec((b, tile_r, lane), lambda i: (0, i, 0)),
            input_output_aliases=io_alias,
            compiler_params=pltpu.CompilerParams(
                dimension_semantics=("parallel",),
                vmem_limit_bytes=budget),
        )(xf, pos)
        return out.reshape(b, l, d)

    # ---------------- fallback: L*D not a multiple of 128 -> (B, L*D) layout --------
    xf = x.reshape(b, flat)
    pos = pos_embed.reshape(1, flat)

    padded_b = max(_round_up(b, 8), 8)          # sublane padding of the B axis
    per_col_bytes = 2 * (2 * padded_b + 8) * itemsize
    max_cols = max(128, int(budget * 0.85) // per_col_bytes)
    if max_block_rows is not None:
        max_cols = min(max_cols, max(128, max_block_rows * 128))
    tile = min(_round_up(flat, 128), (max_cols // 128) * 128)
    tile = max(128, tile)
    steps = pl.cdiv(flat, tile)

    out = pl.pallas_call(
        _pos_add_kernel,
        out_shape=jax.ShapeDtypeStruct((b, flat), x.dtype),
        grid=(steps,),
        in_specs=[
            pl.BlockSpec((b, tile), lambda i: (0, i)),
            pl.BlockSpec((1, tile), lambda i: (0, i)),
        ],
        out_specs=pl.BlockSpec((b, tile), lambda i: (0, i)),
        input_output_aliases=io_alias,
        compiler_params=pltpu.CompilerParams(
            dimension_semantics=("parallel",),
            vmem_limit_bytes=budget),
    )(xf, pos)
    return out.reshape(b, l, d)


# TODO(synk): VitPosEmbed's sincos-table init (is_learnable=False) and the
# allow_interpolation resize are host-side parameter preparation; the
# interpolation branch is unreachable through FlattenPosEmbedBlock (its view
# enforces grid == seqlens), so only the broadcast-add forward is kernelized.


# ----------------------------------------------------------------------------
# Pure-JAX reference
# ----------------------------------------------------------------------------
def flatten_pos_embed_reference(x, pos_embed):
    b, l, d = x.shape
    return (x + pos_embed.reshape(1, l, d)).astype(x.dtype)


def _check(out, ref, tag):
    assert out.shape == ref.shape, (tag, out.shape, ref.shape)
    err = float(jnp.max(jnp.abs(out.astype(jnp.float32) - ref.astype(jnp.float32))))
    assert jnp.allclose(out.astype(jnp.float32), ref.astype(jnp.float32),
                        rtol=1e-6, atol=1e-6), (tag, err)


if __name__ == "__main__":
    root = jax.random.PRNGKey(0)
    k1, k2, k3, k4, k5, k6, k7, k8 = jax.random.split(root, 8)
    B = 2

    # A) 2D case: FlattenPosEmbedBlock([32, 32, [16, 16]]) -> x: (B, H*W, D)
    H, W, D = 16, 16, 32
    x2d = jax.random.normal(k1, (B, H * W, D), jnp.float32)
    pos2d = 0.02 * jax.random.normal(k2, (1, H, W, D), jnp.float32)
    out2d = jax.block_until_ready(flatten_pos_embed_forward(x2d, pos2d))
    _check(out2d, flatten_pos_embed_reference(x2d, pos2d), "2d")

    # B) 3D case: FlattenPosEmbedBlock([32, 32, [4, 8, 8]]) -> x: (B, T*H*W, D)
    T3, H3, W3, D3 = 4, 8, 8, 32
    x3d = jax.random.normal(k3, (B, T3 * H3 * W3, D3), jnp.float32)
    pos3d = 0.02 * jax.random.normal(k4, (1, T3, H3, W3, D3), jnp.float32)
    out3d = jax.block_until_ready(flatten_pos_embed_forward(x3d, pos3d))
    _check(out3d, flatten_pos_embed_reference(x3d, pos3d), "3d")

    # C) mixed precision + multi-step grid with a masked boundary block
    #    (R = 25 rows of C = 1024, tile_r = 8 -> 4 steps, last one partial)
    H4, W4, D4 = 20, 20, 64
    x_mix = jax.random.normal(k5, (B, H4 * W4, D4), jnp.bfloat16)
    pos_mix = 0.02 * jax.random.normal(k6, (1, H4, W4, D4), jnp.float32)
    out_mix = jax.block_until_ready(
        flatten_pos_embed_forward(x_mix, pos_mix, max_block_rows=8))
    _check(out_mix, flatten_pos_embed_reference(x_mix, pos_mix), "mixed")

    # D) fallback path: L*D not a multiple of 128 (seqlens=[5,5], D=24)
    H5, W5, D5 = 5, 5, 24
    x_odd = jax.random.normal(k7, (B, H5 * W5, D5), jnp.float32)
    pos_odd = 0.02 * jax.random.normal(k8, (1, H5, W5, D5), jnp.float32)
    out_odd = jax.block_until_ready(flatten_pos_embed_forward(x_odd, pos_odd))
    _check(out_odd, flatten_pos_embed_reference(x_odd, pos_odd), "fallback")

    print("KERNEL_OK")
</pallas_src>

<mosaic_0001>
module attributes {stable_mosaic.version = 11 : i64} {
  func.func @_pos_add_kernel(%arg0: i32, %arg1: memref<2x8x1024xf32, #tpu.memory_space<vmem>>, %arg2: memref<8x1024xf32, #tpu.memory_space<vmem>>, %arg3: memref<2x8x1024xf32, #tpu.memory_space<vmem>>) attributes {dimension_semantics = [#tpu.dimension_semantics<parallel>], iteration_bounds = array<i64: 1>, scalar_prefetch = 0 : i64, scratch_operands = 0 : i64, tpu.core_type = #tpu.core_type<tc>, window_params = [{transform_indices = @transform_0, window_bounds = array<i64: 2, 8, 1024>}, {transform_indices = @transform_1, window_bounds = array<i64: 8, 1024>}, {transform_indices = @transform_2, window_bounds = array<i64: 2, 8, 1024>}]} {
    %c0 = arith.constant 0 : index
    %c0_0 = arith.constant 0 : index
    %c0_1 = arith.constant 0 : index
    %0 = vector.load %arg1[%c0, %c0_0, %c0_1] : memref<2x8x1024xf32, #tpu.memory_space<vmem>>, vector<2x8x1024xf32>
    %c0_2 = arith.constant 0 : index
    %c0_3 = arith.constant 0 : index
    %1 = vector.load %arg2[%c0_2, %c0_3] : memref<8x1024xf32, #tpu.memory_space<vmem>>, vector<8x1024xf32>
    %2 = vector.shape_cast %1 : vector<8x1024xf32> to vector<1x8x1024xf32>
    %3 = vector.broadcast %2 : vector<1x8x1024xf32> to vector<2x8x1024xf32>
    %4 = arith.addf %0, %3 : vector<2x8x1024xf32>
    %c0_4 = arith.constant 0 : index
    %c0_5 = arith.constant 0 : index
    %c0_6 = arith.constant 0 : index
    %5 = vector.load %arg3[%c0_4, %c0_5, %c0_6] : memref<2x8x1024xf32, #tpu.memory_space<vmem>>, vector<2x8x1024xf32>
    tpu.vector_store %arg3[%c0_4, %c0_5, %c0_6], %4 {strides = array<i32>} : memref<2x8x1024xf32, #tpu.memory_space<vmem>>, vector<2x8x1024xf32>,
    return
  }
  func.func @transform_0(%arg0: i32) -> (i32, i32, i32) {
    %c0_i32 = arith.constant 0 : i32
    %c0_i32_0 = arith.constant 0 : i32
    %c0_i32_1 = arith.constant 0 : i32
    return %c0_i32, %arg0, %c0_i32_0 : i32, i32, i32
  }
  func.func @transform_1(%arg0: i32) -> (i32, i32) {
    %c0_i32 = arith.constant 0 : i32
    %c0_i32_0 = arith.constant 0 : i32
    return %arg0, %c0_i32 : i32, i32
  }
  func.func @transform_2(%arg0: i32) -> (i32, i32, i32) {
    %c0_i32 = arith.constant 0 : i32
    %c0_i32_0 = arith.constant 0 : i32
    %c0_i32_1 = arith.constant 0 : i32
    return %c0_i32, %arg0, %c0_i32_0 : i32, i32, i32
  }
}

</mosaic_0001>

<bundles_post_ra>
// kernel: tpu_custom_call.1
= control target key start
LH: loop header
LB: loop body
LE: loop exit
PB: predicated region body
PF: predicated region fallthrough
CT: control target
= control target key end

     0   :  { %7 = vsyncpa [#allocation3], 0  ;;  %s236_s0 = inlined_call_operand.hbm [shape: f32[2,8,1024], index: 0, kind: input, shape index: {}]   ;;  %s237_s1 = inlined_call_operand.hbm [shape: f32[8,1024], index: 1, kind: input, shape index: {}]   ;;  %s238_s2 = inlined_call_operand.hbm [shape: f32[2,8,1024], index: 2, kind: output, shape index: {}]  }
   0x1   :  { %8 = vsyncpa [#allocation6], 0 }
   0x2   :  { %9 = vsyncpa [#allocation4], 0  ;;  %s14_s11 = sshll.u32 %s236_s0, 4  ;;  %s201_s12 = smov [#allocation2]   ;;  %s15_s11 = int_to_ptr.hbm [resolvable:$true] %s14_s11 }
   0x3   :  { %s16_s13 = sshll.u32 %s201_s12, 4  ;;  %s28_s16 = sshll.u32 %s237_s1, 4  ;;  %s17_s13 = int_to_ptr.vmem [resolvable:$true] %s16_s13  ;;  %s29_s16 = int_to_ptr.hbm [resolvable:$true] %s28_s16 }
   0x4   :  { %s202_s17 = smov 1024   ;;  %s203_s18 = smov 64  }
   0x5   :  { %22 = dma.hbm_to_vmem [thread:$0]  %s15_s11, 2048, %s17_s13, [#allocation3], %s202_s17, %s202_s17, %s203_s18  }
   0x6   :  { %s204_s19 = smov [#allocation5]  }
   0x7   :  { %s30_s20 = sshll.u32 %s204_s19, 4  ;;  %s31_s20 = int_to_ptr.vmem [resolvable:$true] %s30_s20 }
   0x8   :  { %33 = dma.hbm_to_vmem [thread:$0]  %s29_s16, 1024, %s31_s20, [#allocation6]  }
   0x9   :  { %195 = dma.done.wait [#allocation3], 2048  }
   0xa   :  { %196 = vsyncadd [#allocation3], 4294965248 }
   0xb   :  { %197 = dma.done.wait [#allocation6], 1024  }
   0xc   :  { %198 = vsyncadd [#allocation6], 4294966272  ;;  %v42_v0 = vld [vmem:[#allocation2] sm:$0xff]  ;;  %v43_v2 = vld [vmem:[#allocation2 + $0x8] sm:$0xff]  ;;  %s205_s0 = smov [#allocation7]   ;;  %s104_s23 = sshll.u32 %s238_s2, 4  ;;  %s105_s23 = int_to_ptr.hbm [resolvable:$true] %s104_s23 }
   0xd   :  { %v58_v1 = vld [vmem:[#allocation5] sm:$0xff]  ;;  %v59_v4 = vld [vmem:[#allocation5 + $0x8] sm:$0xff]  ;;  %v44_v5 = vld [vmem:[#allocation2 + $0x10] sm:$0xff]  ;;  %s102_s1 = sshll.u32 %s205_s0, 4  ;;  %s103_s1 = int_to_ptr.vmem [resolvable:$true] %s102_s1 }
   0xe   :  { %v66_v3 = vadd.f32 %v58_v1, %v42_v0  ;;  %v60_v6 = vld [vmem:[#allocation5 + $0x10] sm:$0xff]  ;;  %v67_v7 = vadd.f32 %v59_v4, %v43_v2  ;;  %v45_v9 = vld [vmem:[#allocation2 + $0x18] sm:$0xff]  ;;  %v46_v11 = vld [vmem:[#allocation2 + $0x20] sm:$0xff] }
   0xf   :  { %v68_v8 = vadd.f32 %v60_v6, %v44_v5  ;;  %v61_v10 = vld [vmem:[#allocation5 + $0x18] sm:$0xff]  ;;  %v62_v13 = vld [vmem:[#allocation5 + $0x20] sm:$0xff]  ;;  %v47_v14 = vld [vmem:[#allocation2 + $0x28] sm:$0xff] }
  0x10   :  { %82 = vst [vmem:[#allocation7] sm:$0xff] %v66_v3  ;;  %v69_v12 = vadd.f32 %v61_v10, %v45_v9  ;;  %v63_v15 = vld [vmem:[#allocation5 + $0x28] sm:$0xff]  ;;  %v70_v16 = vadd.f32 %v62_v13, %v46_v11  ;;  %v48_v18 = vld [vmem:[#allocation2 + $0x30] sm:$0xff]  ;;  %v49_v20 = vld [vmem:[#allocation2 + $0x38] sm:$0xff] }
  0x11   :  { %83 = vst [vmem:[#allocation7 + $0x8] sm:$0xff] %v67_v7  ;;  %v71_v17 = vadd.f32 %v63_v15, %v47_v14  ;;  %v64_v19 = vld [vmem:[#allocation5 + $0x30] sm:$0xff]  ;;  %v65_v22 = vld [vmem:[#allocation5 + $0x38] sm:$0xff]  ;;  %v50_v23 = vld [vmem:[#allocation2 + $0x40] sm:$0xff] }
  0x12   :  { %84 = vst [vmem:[#allocation7 + $0x10] sm:$0xff] %v68_v8  ;;  %v72_v21 = vadd.f32 %v64_v19, %v48_v18  ;;  %v51_v24 = vld [vmem:[#allocation2 + $0x48] sm:$0xff]  ;;  %v73_v25 = vadd.f32 %v65_v22, %v49_v20  ;;  %v52_v26 = vld [vmem:[#allocation2 + $0x50] sm:$0xff]  ;;  %v74_v27 = vadd.f32 %v58_v1, %v50_v23  ;;  %v53_v28 = vld [vmem:[#allocation2 + $0x58] sm:$0xff] }
  0x13   :  { %85 = vst [vmem:[#allocation7 + $0x18] sm:$0xff] %v69_v12  ;;  %v75_v29 = vadd.f32 %v59_v4, %v51_v24  ;;  %v54_v30 = vld [vmem:[#allocation2 + $0x60] sm:$0xff]  ;;  %v76_v31 = vadd.f32 %v60_v6, %v52_v26  ;;  %v55_v32 = vld [vmem:[#allocation2 + $0x68] sm:$0xff]  ;;  %v77_v33 = vadd.f32 %v61_v10, %v53_v28  ;;  %v56_v34 = vld [vmem:[#allocation2 + $0x70] sm:$0xff] }
  0x14   :  { %86 = vst [vmem:[#allocation7 + $0x20] sm:$0xff] %v70_v16  ;;  %v78_v35 = vadd.f32 %v62_v13, %v54_v30  ;;  %v57_v36 = vld [vmem:[#allocation2 + $0x78] sm:$0xff]  ;;  %v79_v37 = vadd.f32 %v63_v15, %v55_v32  ;;  %v80_v38 = vadd.f32 %v64_v19, %v56_v34 }
  0x15   :  { %87 = vst [vmem:[#allocation7 + $0x28] sm:$0xff] %v71_v17  ;;  %v81_v39 = vadd.f32 %v65_v22, %v57_v36 }
  0x16   :  { %88 = vst [vmem:[#allocation7 + $0x30] sm:$0xff] %v72_v21 }
  0x17   :  { %89 = vst [vmem:[#allocation7 + $0x38] sm:$0xff] %v73_v25 }
  0x18   :  { %90 = vst [vmem:[#allocation7 + $0x40] sm:$0xff] %v74_v27 }
  0x19   :  { %91 = vst [vmem:[#allocation7 + $0x48] sm:$0xff] %v75_v29 }
  0x1a   :  { %92 = vst [vmem:[#allocation7 + $0x50] sm:$0xff] %v76_v31 }
  0x1b   :  { %93 = vst [vmem:[#allocation7 + $0x58] sm:$0xff] %v77_v33 }
  0x1c   :  { %94 = vst [vmem:[#allocation7 + $0x60] sm:$0xff] %v78_v35 }
  0x1d   :  { %95 = vst [vmem:[#allocation7 + $0x68] sm:$0xff] %v79_v37 }
  0x1e   :  { %96 = vst [vmem:[#allocation7 + $0x70] sm:$0xff] %v80_v38 }
  0x1f   :  { %97 = vst [vmem:[#allocation7 + $0x78] sm:$0xff] %v81_v39 }
  0x20   :  { %110 = dma.vmem_to_hbm [thread:$0]  %s103_s1, 2048, %s105_s23, [#allocation4], %s202_s17, %s202_s17, %s203_s18  }
  0x21   :  { %199 = dma.done.wait [#allocation4], 2048  }
  0x22   :  { %200 = vsyncadd [#allocation4], 4294965248 }
  0x23   :  { %115 = vsyncpa [#allocation3], 1 }
  0x24   :  { %116 = vsyncpa [#allocation6], 1 }
  0x25   :  { %117 = vsyncpa [#allocation4], 1 }

</bundles_post_ra>
